<compile_context>
chip_gen: v7x
topology: tpu7x:2x2x1
jax: 0.10.0
libtpu: 0.0.40
codegen_flags: <defaults>
</compile_context>

<pallas_src>
import jax
import jax.numpy as jnp
from jax.experimental import pallas as pl
from jax.experimental.pallas import tpu as pltpu


_LANE = 128


def _round_up(n, m):
    return ((n + m - 1) // m) * m


def _pad2(a, rows, cols):
    return jnp.pad(a, ((0, rows - a.shape[0]), (0, cols - a.shape[1])))


def _policy_kernel(x_ref, w1_ref, b1_ref, w2_ref, b2_ref, w3_ref, b3_ref, mean_ref):
    """One batch tile of the 3-layer MLP head (hidden lanes padded to 128)."""
    cd = w1_ref.dtype
    # In-kernel cast of x (free VPU work hidden under the MXU ops).
    x = x_ref[...].astype(cd)
    # fc1: MXU matmul with f32 accumulation, bias + tanh in the compute dtype.
    h1 = jnp.tanh(
        jnp.dot(x, w1_ref[...], preferred_element_type=jnp.float32).astype(cd)
        + b1_ref[...]
    )
    # fc2
    h2 = jnp.tanh(
        jnp.dot(h1, w2_ref[...], preferred_element_type=jnp.float32).astype(cd)
        + b2_ref[...]
    )
    # mean head: narrow (tb, A) store, bias add kept in f32.
    mean_ref[...] = (
        jnp.dot(h2, w3_ref[...], preferred_element_type=jnp.float32)
        + b3_ref[...]
    ).astype(mean_ref.dtype)


def prepare_params(params, compute_dtype=jnp.bfloat16):
    """One-time padding / casting of the weights for the kernel layout.

    params: dict with w1 (S,H), b1 (H,), w2 (H,H), b2 (H,), w3 (H,A), b3 (A,),
            log_std (A,).  Weights stored (in_features, out_features).
    """
    S, H = params["w1"].shape
    A = params["w3"].shape[1]
    Hp = _round_up(H, _LANE)

    # Zero-padded weight rows/cols and biases keep padded hidden lanes at
    # tanh(0) = 0, contributing nothing downstream.
    prepared = dict(
        w1=_pad2(params["w1"], S, Hp).astype(compute_dtype),
        w2=_pad2(params["w2"], Hp, Hp).astype(compute_dtype),
        w3=_pad2(params["w3"], Hp, A).astype(compute_dtype),
        b1=jnp.pad(params["b1"], (0, Hp - H)).reshape(1, Hp).astype(compute_dtype),
        b2=jnp.pad(params["b2"], (0, Hp - H)).reshape(1, Hp).astype(compute_dtype),
        b3=params["b3"].reshape(1, A).astype(jnp.float32),
        log_std=params["log_std"].astype(jnp.float32),
    )
    return prepared


def _pick_batch_tile(B, block_batch):
    """Batch tile: big enough to amortize per-step overhead, >=2 grid steps
    when the batch allows (v7x megacore), multiple of 8 unless B is tiny."""
    if B <= 8:
        return B
    if B > block_batch:
        return block_batch
    # Split into (at least) 2 grid steps for megacore sharding on v7x.
    half = _round_up(pl.cdiv(B, 2), 8)
    return min(half, B) if B >= 16 else B


def reinforce_policy_forward(x, prepared, *, block_batch=2048):
    """ReinforcePolicy forward.

    x: (B, state_dim) float32
    prepared: output of prepare_params().
    returns: (mean (B, A) float32, std (A,) float32)
    """
    B, S = x.shape
    Hp = prepared["w1"].shape[1]
    A = prepared["w3"].shape[1]

    tb = _pick_batch_tile(B, block_batch)
    grid = (pl.cdiv(B, tb),)

    resident = lambda i: (0, 0)      # weights/biases: same block every grid step
    batch_tile = lambda i: (i, 0)    # x / mean walk down the batch

    itemsize = jnp.dtype(prepared["w1"].dtype).itemsize
    cost = pl.CostEstimate(
        flops=2 * B * (S * Hp + Hp * Hp + Hp * A),
        transcendentals=2 * B * Hp,
        bytes_accessed=(B * S * x.dtype.itemsize               # x read
                        + B * A * 4                            # mean write
                        + (S * Hp + Hp * Hp + Hp * A) * itemsize
                        + (2 * Hp) * itemsize + A * 4),        # biases
    )

    mean = pl.pallas_call(
        _policy_kernel,
        out_shape=jax.ShapeDtypeStruct((B, A), jnp.float32),
        grid=grid,
        in_specs=[
            pl.BlockSpec((tb, S), batch_tile),
            pl.BlockSpec((S, Hp), resident),
            pl.BlockSpec((1, Hp), resident),
            pl.BlockSpec((Hp, Hp), resident),
            pl.BlockSpec((1, Hp), resident),
            pl.BlockSpec((Hp, A), resident),
            pl.BlockSpec((1, A), resident),
        ],
        out_specs=pl.BlockSpec((tb, A), batch_tile),
        compiler_params=pltpu.CompilerParams(
            dimension_semantics=("parallel",)),
        cost_estimate=cost,
    )(x, prepared["w1"], prepared["b1"], prepared["w2"], prepared["b2"],
      prepared["w3"], prepared["b3"])

    # std = exp(log_std) is batch-independent; keep it out of the kernel.
    std = jnp.exp(prepared["log_std"])
    return mean, std


def init_params(key, state_dim, action_dim, hidden_dim=64):
    """nn.Linear default init: U(-1/sqrt(fan_in), 1/sqrt(fan_in)) for W and b.
    Weights stored (in_features, out_features) for the kernel layout."""
    def linear(key, fan_in, fan_out):
        kw, kb = jax.random.split(key)
        bound = 1.0 / jnp.sqrt(fan_in)
        w = jax.random.uniform(kw, (fan_in, fan_out), jnp.float32, -bound, bound)
        b = jax.random.uniform(kb, (fan_out,), jnp.float32, -bound, bound)
        return w, b

    k1, k2, k3 = jax.random.split(key, 3)
    w1, b1 = linear(k1, state_dim, hidden_dim)
    w2, b2 = linear(k2, hidden_dim, hidden_dim)
    w3, b3 = linear(k3, hidden_dim, action_dim)
    log_std = jnp.zeros((action_dim,), jnp.float32)   # nn.Parameter(torch.zeros(A))
    return dict(w1=w1, b1=b1, w2=w2, b2=b2, w3=w3, b3=b3, log_std=log_std)


def reference_forward(x, params):
    """Pure-JAX f32 reference."""
    h1 = jnp.tanh(jnp.dot(x, params["w1"]) + params["b1"])
    h2 = jnp.tanh(jnp.dot(h1, params["w2"]) + params["b2"])
    mean = jnp.dot(h2, params["w3"]) + params["b3"]
    std = jnp.exp(params["log_std"])
    return mean, std


if __name__ == "__main__":
    key = jax.random.PRNGKey(0)
    k_param, k_x = jax.random.split(key)

    batch, state_dim, action_dim, hidden_dim = 2, 8, 4, 64
    params = init_params(k_param, state_dim, action_dim, hidden_dim)
    x = jax.random.normal(k_x, (batch, state_dim), jnp.float32)

    ref_mean, ref_std = reference_forward(x, params)

    # Exact-precision path (f32 end to end) — tight check.
    prep32 = prepare_params(params, compute_dtype=jnp.float32)
    mean32, std32 = reinforce_policy_forward(x, prep32)
    jax.block_until_ready((mean32, std32))
    assert mean32.shape == (batch, action_dim)
    assert std32.shape == (action_dim,)
    assert jnp.allclose(mean32, ref_mean, atol=5e-4), "f32 mean mismatch"
    assert jnp.allclose(std32, ref_std, atol=1e-6), "std mismatch"

    # Optimized bf16 path (bf16 MXU operands + bf16 activations, f32 accumulate)
    # — loose check vs the f32 reference.
    prep_bf = prepare_params(params, compute_dtype=jnp.bfloat16)
    mean_bf, std_bf = reinforce_policy_forward(x, prep_bf)
    jax.block_until_ready((mean_bf, std_bf))
    assert jnp.allclose(mean_bf, ref_mean, atol=5e-2), "bf16 mean mismatch"
    assert jnp.allclose(std_bf, ref_std, atol=1e-6), "std mismatch (bf16 path)"

    # Larger batch to exercise the multi-step grid path (>=2 steps, 'parallel').
    xb = jax.random.normal(k_x, (96, state_dim), jnp.float32)
    mean_b, _ = reinforce_policy_forward(xb, prep32, block_batch=2048)
    jax.block_until_ready(mean_b)
    ref_b, _ = reference_forward(xb, params)
    assert jnp.allclose(mean_b, ref_b, atol=5e-4), "multi-tile mean mismatch"

    print("KERNEL_OK")
</pallas_src>

<mosaic_0001>
module attributes {stable_mosaic.version = 11 : i64} {
  func.func @_policy_kernel(%arg0: i32, %arg1: memref<2x8xf32, #tpu.memory_space<vmem>>, %arg2: memref<8x128xf32, #tpu.memory_space<vmem>>, %arg3: memref<1x128xf32, #tpu.memory_space<vmem>>, %arg4: memref<128x128xf32, #tpu.memory_space<vmem>>, %arg5: memref<1x128xf32, #tpu.memory_space<vmem>>, %arg6: memref<128x4xf32, #tpu.memory_space<vmem>>, %arg7: memref<1x4xf32, #tpu.memory_space<vmem>>, %arg8: memref<2x4xf32, #tpu.memory_space<vmem>>) attributes {dimension_semantics = [#tpu.dimension_semantics<parallel>], iteration_bounds = array<i64: 1>, scalar_prefetch = 0 : i64, scratch_operands = 0 : i64, tpu.core_type = #tpu.core_type<tc>, window_params = [{transform_indices = @transform_0, window_bounds = array<i64: 2, 8>}, {pipeline_mode = #tpu.pipeline_mode<synchronous>, transform_indices = @transform_1, window_bounds = array<i64: 8, 128>}, {pipeline_mode = #tpu.pipeline_mode<synchronous>, transform_indices = @transform_2, window_bounds = array<i64: 1, 128>}, {pipeline_mode = #tpu.pipeline_mode<synchronous>, transform_indices = @transform_3, window_bounds = array<i64: 128, 128>}, {pipeline_mode = #tpu.pipeline_mode<synchronous>, transform_indices = @transform_4, window_bounds = array<i64: 1, 128>}, {pipeline_mode = #tpu.pipeline_mode<synchronous>, transform_indices = @transform_5, window_bounds = array<i64: 128, 4>}, {pipeline_mode = #tpu.pipeline_mode<synchronous>, transform_indices = @transform_6, window_bounds = array<i64: 1, 4>}, {transform_indices = @transform_7, window_bounds = array<i64: 2, 4>}]} {
    %c0 = arith.constant 0 : index
    %c0_0 = arith.constant 0 : index
    %0 = vector.load %arg1[%c0, %c0_0] : memref<2x8xf32, #tpu.memory_space<vmem>>, vector<2x8xf32>
    %c0_1 = arith.constant 0 : index
    %c0_2 = arith.constant 0 : index
    %1 = vector.load %arg2[%c0_1, %c0_2] : memref<8x128xf32, #tpu.memory_space<vmem>>, vector<8x128xf32>
    %cst = arith.constant dense<0.000000e+00> : vector<2x128xf32>
    %2 = tpu.matmul %0, %1, %cst {dimension_numbers = #tpu.dot_dimension_numbers<[1], [0], [0], [1], [0, 0, 1, 1], [], []>} : vector<2x8xf32>, vector<8x128xf32>, vector<2x128xf32> -> vector<2x128xf32>
    %c0_3 = arith.constant 0 : index
    %c0_4 = arith.constant 0 : index
    %3 = vector.load %arg3[%c0_3, %c0_4] : memref<1x128xf32, #tpu.memory_space<vmem>>, vector<1x128xf32>
    %4 = vector.broadcast %3 : vector<1x128xf32> to vector<2x128xf32>
    %5 = arith.addf %2, %4 : vector<2x128xf32>
    %6 = math.tanh %5 : vector<2x128xf32>
    %c0_5 = arith.constant 0 : index
    %c0_6 = arith.constant 0 : index
    %7 = vector.load %arg4[%c0_5, %c0_6] : memref<128x128xf32, #tpu.memory_space<vmem>>, vector<128x128xf32>
    %cst_7 = arith.constant dense<0.000000e+00> : vector<2x128xf32>
    %8 = tpu.matmul %6, %7, %cst_7 {dimension_numbers = #tpu.dot_dimension_numbers<[1], [0], [0], [1], [0, 0, 1, 1], [], []>} : vector<2x128xf32>, vector<128x128xf32>, vector<2x128xf32> -> vector<2x128xf32>
    %c0_8 = arith.constant 0 : index
    %c0_9 = arith.constant 0 : index
    %9 = vector.load %arg5[%c0_8, %c0_9] : memref<1x128xf32, #tpu.memory_space<vmem>>, vector<1x128xf32>
    %10 = vector.broadcast %9 : vector<1x128xf32> to vector<2x128xf32>
    %11 = arith.addf %8, %10 : vector<2x128xf32>
    %12 = math.tanh %11 : vector<2x128xf32>
    %c0_10 = arith.constant 0 : index
    %c0_11 = arith.constant 0 : index
    %13 = vector.load %arg6[%c0_10, %c0_11] : memref<128x4xf32, #tpu.memory_space<vmem>>, vector<128x4xf32>
    %cst_12 = arith.constant dense<0.000000e+00> : vector<2x4xf32>
    %14 = tpu.matmul %12, %13, %cst_12 {dimension_numbers = #tpu.dot_dimension_numbers<[1], [0], [0], [1], [0, 0, 1, 1], [], []>} : vector<2x128xf32>, vector<128x4xf32>, vector<2x4xf32> -> vector<2x4xf32>
    %c0_13 = arith.constant 0 : index
    %c0_14 = arith.constant 0 : index
    %15 = vector.load %arg7[%c0_13, %c0_14] : memref<1x4xf32, #tpu.memory_space<vmem>>, vector<1x4xf32>
    %16 = vector.broadcast %15 : vector<1x4xf32> to vector<2x4xf32>
    %17 = arith.addf %14, %16 : vector<2x4xf32>
    %c0_15 = arith.constant 0 : index
    %c0_16 = arith.constant 0 : index
    %18 = vector.load %arg8[%c0_15, %c0_16] : memref<2x4xf32, #tpu.memory_space<vmem>>, vector<2x4xf32>
    tpu.vector_store %arg8[%c0_15, %c0_16], %17 {strides = array<i32>} : memref<2x4xf32, #tpu.memory_space<vmem>>, vector<2x4xf32>,
    return
  }
  func.func @transform_0(%arg0: i32) -> (i32, i32) {
    %c0_i32 = arith.constant 0 : i32
    %c0_i32_0 = arith.constant 0 : i32
    return %arg0, %c0_i32 : i32, i32
  }
  func.func @transform_1(%arg0: i32) -> (i32, i32) {
    %c0_i32 = arith.constant 0 : i32
    %c0_i32_0 = arith.constant 0 : i32
    %c0_i32_1 = arith.constant 0 : i32
    return %c0_i32, %c0_i32_0 : i32, i32
  }
  func.func @transform_2(%arg0: i32) -> (i32, i32) {
    %c0_i32 = arith.constant 0 : i32
    %c0_i32_0 = arith.constant 0 : i32
    %c0_i32_1 = arith.constant 0 : i32
    return %c0_i32, %c0_i32_0 : i32, i32
  }
  func.func @transform_3(%arg0: i32) -> (i32, i32) {
    %c0_i32 = arith.constant 0 : i32
    %c0_i32_0 = arith.constant 0 : i32
    %c0_i32_1 = arith.constant 0 : i32
    return %c0_i32, %c0_i32_0 : i32, i32
  }
  func.func @transform_4(%arg0: i32) -> (i32, i32) {
    %c0_i32 = arith.constant 0 : i32
    %c0_i32_0 = arith.constant 0 : i32
    %c0_i32_1 = arith.constant 0 : i32
    return %c0_i32, %c0_i32_0 : i32, i32
  }
  func.func @transform_5(%arg0: i32) -> (i32, i32) {
    %c0_i32 = arith.constant 0 : i32
    %c0_i32_0 = arith.constant 0 : i32
    %c0_i32_1 = arith.constant 0 : i32
    return %c0_i32, %c0_i32_0 : i32, i32
  }
  func.func @transform_6(%arg0: i32) -> (i32, i32) {
    %c0_i32 = arith.constant 0 : i32
    %c0_i32_0 = arith.constant 0 : i32
    %c0_i32_1 = arith.constant 0 : i32
    return %c0_i32, %c0_i32_0 : i32, i32
  }
  func.func @transform_7(%arg0: i32) -> (i32, i32) {
    %c0_i32 = arith.constant 0 : i32
    %c0_i32_0 = arith.constant 0 : i32
    return %arg0, %c0_i32 : i32, i32
  }
}

</mosaic_0001>

<bundles_post_ra>
// kernel: tpu_custom_call.1
= control target key start
LH: loop header
LB: loop body
LE: loop exit
PB: predicated region body
PF: predicated region fallthrough
CT: control target
= control target key end

     0   :  { %vm36_vm0 = vcmask 64512   ;;  %v509_v2 = vmov 0.0   ;;  %vm510_vm1 = vmmov 0   ;;  %v511_v6 = vmov 0.0|0.0   ;;  %s695_s0 = inlined_call_operand.vmem [shape: f32[2,8], index: 0, kind: input, shape index: {}]   ;;  %s696_s1 = inlined_call_operand.vmem [shape: f32[8,128], index: 1, kind: input, shape index: {}]   ;;  %s697_s2 = inlined_call_operand.vmem [shape: f32[1,128], index: 2, kind: input, shape index: {}]   ;;  %s698_s3 = inlined_call_operand.vmem [shape: f32[128,128], index: 3, kind: input, shape index: {}]   ;;  %s699_s4 = inlined_call_operand.vmem [shape: f32[1,128], index: 4, kind: input, shape index: {}]   ;;  %s700_s5 = inlined_call_operand.vmem [shape: f32[128,4], index: 5, kind: input, shape index: {}]   ;;  %s701_s6 = inlined_call_operand.vmem [shape: f32[1,4], index: 6, kind: input, shape index: {}]   ;;  %s702_s7 = inlined_call_operand.hbm [shape: f32[2,4], index: 7, kind: output, shape index: {}]  }
   0x1   :  { %v28_v0 = vld [vmem:[%s696_s1] sm:$0xff]  ;;  %354 = vmatprep.subr.mxu0 %v509_v2  ;;  %356 = vmatprep.mubr.msk.f32.mxu0 %vm510_vm1, %v509_v2  ;;  %v112_v4 = vld [vmem:[%s698_s3 + $0x8] sm:$0xff]  ;;  %v113_v5 = vld [vmem:[%s698_s3 + $0x10] sm:$0xff] }
   0x2   :  { %v27_v1 = vld [vmem:[%s695_s0] sm:$0x3]  ;;  %355 = vmatpush3.msra.mxu0 %v28_v0  ;;  %429 = vmatprep.subr.bf16.mxu1 %v511_v6  ;;  %v114_v8 = vld [vmem:[%s698_s3 + $0x18] sm:$0xff] }
   0x3   :  { %v111_v3 = vld [vmem:[%s698_s3] sm:$0xff]  ;;  %357 = vmatmul.mubr.msk.f32.vlgmr.msra.gmra.mrb[0].mxu0 %vm36_vm0, %v27_v1  ;;  %391 = vmatprep.mubr.msk.f32.mxu1 %vm510_vm1, %v509_v2  ;;  %v433_v9 = vpack.c.bf16 %v114_v8, %v113_v5 }
   0x4   :  { %v430_v7 = vpack.c.bf16 %v112_v4, %v111_v3  ;;  %453 = vmatprep.subr.bf16.mxu0 %v511_v6 }
   0x6   :  { %431 = vmatpush3.bf16.msra.mxu1 %v430_v7 }
   0x7   :  { %12 = vsyncpa [#allocation3], 0  ;;  %432 = vmatprep.subr.bf16.mxu1 %v511_v6  ;;  %v115_v10 = vld [vmem:[%s698_s3 + $0x20] sm:$0xff]  ;;  %v116_v11 = vld [vmem:[%s698_s3 + $0x28] sm:$0xff]  ;;  %426 = vmatprep.mubr.msk.f32.mxu0 %vm510_vm1, %v509_v2  ;;  %vm298_vm2 = vcmask 25600  }
   0x8   :  { %v436_v12 = vpack.c.bf16 %v116_v11, %v115_v10  ;;  %v117_v13 = vld [vmem:[%s698_s3 + $0x30] sm:$0xff]  ;;  %v118_v14 = vld [vmem:[%s698_s3 + $0x38] sm:$0xff]  ;;  %v119_v16 = vld [vmem:[%s698_s3 + $0x40] sm:$0xff] }
   0x9   :  { %v439_v15 = vpack.c.bf16 %v118_v14, %v117_v13  ;;  %v120_v17 = vld [vmem:[%s698_s3 + $0x48] sm:$0xff]  ;;  %v121_v19 = vld [vmem:[%s698_s3 + $0x50] sm:$0xff]  ;;  %v122_v20 = vld [vmem:[%s698_s3 + $0x58] sm:$0xff] }
   0xa   :  { %434 = vmatpush3.bf16.msra.mxu1 %v433_v9  ;;  %v442_v18 = vpack.c.bf16 %v120_v17, %v119_v16  ;;  %v445_v21 = vpack.c.bf16 %v122_v20, %v121_v19  ;;  %v123_v22 = vld [vmem:[%s698_s3 + $0x60] sm:$0xff]  ;;  %v124_v23 = vld [vmem:[%s698_s3 + $0x68] sm:$0xff]  ;;  %v125_v25 = vld [vmem:[%s698_s3 + $0x70] sm:$0xff] }
   0xb   :  { %435 = vmatprep.subr.bf16.mxu1 %v511_v6  ;;  %v448_v24 = vpack.c.bf16 %v124_v23, %v123_v22  ;;  %v126_v26 = vld [vmem:[%s698_s3 + $0x78] sm:$0xff]  ;;  %v205_v28 = vld [vmem:[%s700_s5] sm:$0xff]  ;;  %v206_v29 = vld [vmem:[%s700_s5 + $0x8] sm:$0xff] }
   0xc   :  { %v451_v27 = vpack.c.bf16 %v126_v26, %v125_v25  ;;  %v207_v30 = vld [vmem:[%s700_s5 + $0x10] sm:$0xff]  ;;  %v454_v31 = vpack.c.bf16 %v206_v29, %v205_v28  ;;  %v208_v32 = vld [vmem:[%s700_s5 + $0x18] sm:$0xff]  ;;  %v209_v34 = vld [vmem:[%s700_s5 + $0x20] sm:$0xff] }
   0xd   :  { %v457_v33 = vpack.c.bf16 %v208_v32, %v207_v30  ;;  %v210_v35 = vld [vmem:[%s700_s5 + $0x28] sm:$0xff]  ;;  %v211_v37 = vld [vmem:[%s700_s5 + $0x30] sm:$0xff]  ;;  %v212_v38 = vld [vmem:[%s700_s5 + $0x38] sm:$0xff] }
   0xe   :  { %437 = vmatpush3.bf16.msra.mxu1 %v436_v12  ;;  %455 = vmatpush3.bf16.msra.mxu0 %v454_v31  ;;  %v460_v36 = vpack.c.bf16 %v210_v35, %v209_v34  ;;  %v463_v39 = vpack.c.bf16 %v212_v38, %v211_v37  ;;  %v213_v40 = vld [vmem:[%s700_s5 + $0x40] sm:$0xff]  ;;  %v214_v41 = vld [vmem:[%s700_s5 + $0x48] sm:$0xff]  ;;  %v215_v48 = vld [vmem:[%s700_s5 + $0x50] sm:$0xff] }
   0xf   :  { %438 = vmatprep.subr.bf16.mxu1 %v511_v6  ;;  %456 = vmatprep.subr.bf16.mxu0 %v511_v6  ;;  %v466_v42 = vpack.c.bf16 %v214_v41, %v213_v40  ;;  %v314_v43 = vld [vmem:[%s697_s2] ss:$0 sm:$0xff]  ;;  %v216_v49 = vld [vmem:[%s700_s5 + $0x58] sm:$0xff]  ;;  %v218_v52 = vld [vmem:[%s700_s5 + $0x68] sm:$0xff] }
  0x10   :  { %v469_v50 = vpack.c.bf16 %v216_v49, %v215_v48  ;;  %v217_v51 = vld [vmem:[%s700_s5 + $0x60] sm:$0xff]  ;;  %v219_v54 = vld [vmem:[%s700_s5 + $0x70] sm:$0xff]  ;;  %v220_v55 = vld [vmem:[%s700_s5 + $0x78] sm:$0xff]  ;;  %s512_s5 = smov [#allocation2]  }
  0x11   :  { %v472_v53 = vpack.c.bf16 %v218_v52, %v217_v51  ;;  %v475_v56 = vpack.c.bf16 %v220_v55, %v219_v54  ;;  %v316_v57 = vld [vmem:[%s699_s4] ss:$0 sm:$0xff]  ;;  %s306_s20 = sshll.u32 %s512_s5, 4  ;;  %s307_s20 = int_to_ptr.vmem [resolvable:$true] %s306_s20 }
  0x12   :  { %440 = vmatpush3.bf16.msra.mxu1 %v439_v15  ;;  %458 = vmatpush3.bf16.msra.mxu0 %v457_v33  ;;  %v317_v62 = vld [vmem:[%s701_s6] ss:$0 sm:$0xff]  ;;  %s485_s21 = scalar_lea.vmem %s307_s20, 32  ;;  %p490_p1 = scmp.lt.s32.totalorder %s307_s20, %s307_s20 }
  0x13   :  { %441 = vmatprep.subr.bf16.mxu1 %v511_v6  ;;  %459 = vmatprep.subr.bf16.mxu0 %v511_v6  ;;  %p486_p0 = scmp.ne.s32.totalorder %s307_s20, %s485_s21  ;;  %p491_p2 = scmp.lt.s32.totalorder %s485_s21, %s485_s21 }
  0x15   :  { %p492_p3 = por %p491_p2, %p490_p1 }
  0x16   :  { %443 = vmatpush3.bf16.msra.mxu1 %v442_v18  ;;  %461 = vmatpush3.bf16.msra.mxu0 %v460_v36 }
  0x17   :  { %444 = vmatprep.subr.bf16.mxu1 %v511_v6  ;;  %462 = vmatprep.subr.bf16.mxu0 %v511_v6  ;;  %p493_p4 = pnand %p492_p3, %p486_p0 }
  0x1a   :  { %446 = vmatpush3.bf16.msra.mxu1 %v445_v21  ;;  %464 = vmatpush3.bf16.msra.mxu0 %v463_v39 }
  0x1b   :  { %447 = vmatprep.subr.bf16.mxu1 %v511_v6  ;;  %465 = vmatprep.subr.bf16.mxu0 %v511_v6 }
  0x1e   :  { %449 = vmatpush3.bf16.msra.mxu1 %v448_v24  ;;  %467 = vmatpush3.bf16.msra.mxu0 %v466_v42 }
  0x1f   :  { %450 = vmatprep.subr.bf16.mxu1 %v511_v6  ;;  %468 = vmatprep.subr.bf16.mxu0 %v511_v6 }
  0x22   :  { %452 = vmatpush3.bf16.msra.mxu1 %v451_v27  ;;  %470 = vmatpush3.bf16.msra.mxu0 %v469_v50 }
  0x23   :  { %471 = vmatprep.subr.bf16.mxu0 %v511_v6 }
  0x26   :  { %473 = vmatpush3.bf16.msra.mxu0 %v472_v53 }
  0x27   :  { %474 = vmatprep.subr.bf16.mxu0 %v511_v6 }
  0x2a   :  { %476 = vmatpush3.bf16.msra.mxu0 %v475_v56 }
  0xd6   :  { %v106_v44 = vpop.f32.mrb[0].mxu0 }
  0xd7   :  { %v107_v45 = vadd.f32 %v314_v43, %v106_v44  ;;  %v358_v46 = vpop.f32.mrb[1].mxu0 }
  0xd9   :  { %481 = vtanh.f32 %v107_v45 }
  0xe3   :  { %v482_v47 = vpop.eup %481 }
  0xe4   :  { %392 = vmatmul.mubr.f32.vlgmr.msra.gmra.mrb[0].mxu1 %v482_v47 }
 0x1b7   :  { %v200_v58 = vpop.f32.mrb[0].mxu1 }
 0x1b8   :  { %v201_v59 = vadd.f32 %v316_v57, %v200_v58  ;;  %v393_v60 = vpop.f32.mrb[1].mxu1 }
 0x1ba   :  { %483 = vtanh.f32 %v201_v59 }
 0x1c4   :  { %v484_v61 = vpop.eup %483 }
 0x1c5   :  { %427 = vmatmul.mubr.f32.vlgmr.msra.gmra.mrb[2].mxu0 %v484_v61 }
 0x298   :  { %v294_v63 = vpop.f32.mrb[2].mxu0 }
 0x299   :  { %v295_v0 = vadd.f32 %v317_v62, %v294_v63  ;;  %v428_v1 = vpop.f32.mrb[3].mxu0 }
 0x29b   :  { %299 = vst.msk [vmem:[#allocation2] sm:$0x3] %vm298_vm2, %v295_v0 }
 0x29c   :  { %496 = shalt.err (!%p493_p4)
}
 0x29d   :  { %s497_s23 = scalar_lea.hbm %s702_s7, 32 }
 0x29e   :  { %p498_p5 = scmp.ne.s32.totalorder %s702_s7, %s497_s23  ;;  %p501_p6 = scmp.lt.u32.totalorder %s497_s23, %s702_s7 }
 0x2a0   :  { %p503_p7 = pnand %p501_p6, %p498_p5 }
 0x2a2   :  { %506 = shalt.err (!%p503_p7)
}
 0x2a3   :  { %309 = dma.vmem_to_hbm [thread:$0]  %s307_s20, 32, %s702_s7, [#allocation3]  }
 0x2a4   :  { %507 = dma.done.wait [#allocation3], 32  }
 0x2a5   :  { %508 = vsyncadd [#allocation3], 4294967264 }
 0x2a6   :  { %313 = vsyncpa [#allocation3], 1 }

</bundles_post_ra>
